<compile_context>
chip_gen: v7x
topology: tpu7x:2x2x1
jax: 0.10.0
libtpu: 0.0.40
codegen_flags: <defaults>
</compile_context>

<pallas_src>
import functools

import jax
import jax.numpy as jnp
from jax.experimental import pallas as pl
from jax.experimental.pallas import tpu as pltpu

# Per-block byte budget for the x / out tiles.  With input AND output
# double-buffered the pipeline holds ~4x this, which fits the default scoped
# VMEM on all generations (v7x: 32 MiB scoped of 64 MiB physical).
_VMEM_BLOCK_BUDGET = 8 * 1024 * 1024


def _pick_block(dim, cap, quantum=1):
    """Largest divisor of `dim` that is <= cap and a multiple of `quantum`.
    Falls back to `dim` (a full-extent block is always a legal block shape)."""
    if dim <= cap:
        return dim
    best = None
    d = quantum
    while d <= cap:
        if dim % d == 0:
            best = d
        d += quantum
    return best if best is not None else dim


# --------------------------------------------------------------------------
# TrainableMask (the spec module): weight-only, runs once per forward.
# --------------------------------------------------------------------------
def _trainable_mask_kernel(w_ref, masks_ref, thr_ref, mask_ref):
    # mask = ind_0 * (m_0 + ind_1 * (m_1 + ... ind_{k-1} * (m_{k-1} + 0)))
    # ind_i = float(||W * m_i||_F > t_i)   (strict '>', back-to-front nesting)
    # The straight-through `(hard - sigmoid).detach() + sigmoid` indicator has
    # forward value == hard indicator.  The 1x1 kernel-size mask passed to
    # TrainableMask.forward is all-ones -> identity, omitted.
    w = w_ref[...]                                            # (C, CR) f32
    acc = jnp.zeros((1, w.shape[1]), jnp.float32)
    for i in range(masks_ref.shape[0] - 1, -1, -1):
        m = masks_ref[i:i + 1, :]                             # (1, CR)
        wm = w * m
        sq = jnp.sum(wm * wm, axis=1, keepdims=True)          # (C, 1)
        norm = jnp.sqrt(jnp.sum(sq, axis=0, keepdims=True))   # (1, 1) Frobenius
        ind = (norm > thr_ref[i]).astype(jnp.float32)         # thr scalar from SMEM
        acc = ind * (m + acc)
    mask_ref[...] = acc


def trainable_mask_forward(weight_t, masks, thresholds):
    """Pallas TrainableMask.forward: weight_t (C, CR), masks (n, CR),
    thresholds (n,) -> learned channel mask (1, CR)."""
    n_masks, c_out = masks.shape
    return pl.pallas_call(
        _trainable_mask_kernel,
        out_shape=jax.ShapeDtypeStruct((1, c_out), jnp.float32),
        in_specs=[
            pl.BlockSpec(memory_space=pltpu.MemorySpace.VMEM),
            pl.BlockSpec(memory_space=pltpu.MemorySpace.VMEM),
            pl.BlockSpec(memory_space=pltpu.MemorySpace.SMEM),  # thresholds: scalars
        ],
        out_specs=pl.BlockSpec(memory_space=pltpu.MemorySpace.VMEM),
    )(weight_t.astype(jnp.float32), masks.astype(jnp.float32),
      thresholds.astype(jnp.float32))


# --------------------------------------------------------------------------
# Fused SE path: one pass over x, gridded (pipelined) over N.
# --------------------------------------------------------------------------
def _se_fused_kernel(w1_ref, b1_ref, w2_ref, b2_ref, x_ref, o_ref, *, inv_hw):
    xf = x_ref[...].astype(jnp.float32)                       # (tn, C, HW)
    pooled = jnp.sum(xf, axis=-1) * inv_hw                    # AdaptiveAvgPool2d(1)
    y = jnp.dot(pooled, w1_ref[...],
                preferred_element_type=jnp.float32) + b1_ref[...]
    y = jnp.maximum(y, 0.0)                                   # squeeze act: ReLU
    y = jnp.dot(y, w2_ref[...],
                preferred_element_type=jnp.float32) + b2_ref[...]
    s = jax.nn.sigmoid(y)                                     # excite act: sigmoid
    o_ref[...] = (xf * s[:, :, None]).astype(o_ref.dtype)     # x * op(x)


# --------------------------------------------------------------------------
# Split SE path: tiled avg-pool reduction + (XLA micro-MLP) + tiled scale.
# --------------------------------------------------------------------------
def _avgpool_kernel(x_ref, pooled_ref, acc_ref, *, inv_hw):
    k = pl.program_id(1)                                      # HW (reduction) axis

    @pl.when(k == 0)
    def _init():
        acc_ref[...] = jnp.zeros_like(acc_ref)

    xf = x_ref[...].astype(jnp.float32)                       # (tn, C, thw)
    acc_ref[...] += jnp.sum(xf, axis=-1, keepdims=True)       # (tn, C, 1)

    @pl.when(k == pl.num_programs(1) - 1)
    def _finalize():
        pooled_ref[...] = acc_ref[...] * inv_hw


def _scale_kernel(s_ref, x_ref, o_ref):
    xf = x_ref[...].astype(jnp.float32)                       # (tn, C, thw)
    o_ref[...] = (xf * s_ref[...]).astype(o_ref.dtype)        # broadcast over lanes


# --------------------------------------------------------------------------
# Wrapper
# --------------------------------------------------------------------------
def super_se_forward(x_nchw, params, *, mode="auto", block_n=None, block_hw=None):
    """x_nchw: (N, C, H, W), any float dtype (bf16 halves HBM traffic; math is
    f32 inside).  params = (w1_t (C,CR), b1 (1,CR), masks (n,CR), thr (n,),
    w2_t (CR,C), b2 (1,C))."""
    n, c, h, w = x_nchw.shape
    hw = h * w
    x = x_nchw.reshape(n, c, hw)
    w1_t, b1, masks, thr, w2_t, b2 = params
    w1_t = w1_t.astype(jnp.float32)
    b1 = b1.astype(jnp.float32)
    w2_t = w2_t.astype(jnp.float32)
    b2 = b2.astype(jnp.float32)

    # TrainableMask: weight-only, runs once (NOT per x tile).
    ch_mask = trainable_mask_forward(w1_t, masks, thr)        # (1, CR)
    w1_eff = w1_t * ch_mask                                   # (C, CR)

    itemsize = x.dtype.itemsize
    per_sample = c * hw * itemsize
    inv_hw = 1.0 / float(hw)

    if mode == "auto":
        mode = "fused" if per_sample <= _VMEM_BLOCK_BUDGET else "split"

    if mode == "fused":
        # One read + one write of x; grid over N, both buffers pipelined.
        if block_n is None:
            block_n = _pick_block(n, max(1, _VMEM_BLOCK_BUDGET // per_sample))
        assert n % block_n == 0, "block_n must divide N"
        out = pl.pallas_call(
            functools.partial(_se_fused_kernel, inv_hw=inv_hw),
            out_shape=jax.ShapeDtypeStruct((n, c, hw), x.dtype),
            grid=(n // block_n,),
            in_specs=[
                pl.BlockSpec(w1_eff.shape, lambda i: (0, 0)),
                pl.BlockSpec(b1.shape, lambda i: (0, 0)),
                pl.BlockSpec(w2_t.shape, lambda i: (0, 0)),
                pl.BlockSpec(b2.shape, lambda i: (0, 0)),
                pl.BlockSpec((block_n, c, hw), lambda i: (i, 0, 0)),
            ],
            out_specs=pl.BlockSpec((block_n, c, hw), lambda i: (i, 0, 0)),
            compiler_params=pltpu.CompilerParams(
                dimension_semantics=("parallel",)),
        )(w1_eff, b1, w2_t, b2, x)
        return out.reshape(n, c, h, w)

    # ---- split path (per-sample slab too big for a VMEM tile) -------------
    if block_n is None:
        block_n = _pick_block(n, 8)
    if block_hw is None:
        cap_hw = max(128, _VMEM_BLOCK_BUDGET // max(1, block_n * c * itemsize))
        block_hw = _pick_block(hw, cap_hw, quantum=128)       # lane-dense tiles
    assert n % block_n == 0 and hw % block_hw == 0
    grid = (n // block_n, hw // block_hw)

    pooled = pl.pallas_call(
        functools.partial(_avgpool_kernel, inv_hw=inv_hw),
        out_shape=jax.ShapeDtypeStruct((n, c, 1), jnp.float32),
        grid=grid,
        in_specs=[pl.BlockSpec((block_n, c, block_hw), lambda i, k: (i, 0, k))],
        out_specs=pl.BlockSpec((block_n, c, 1), lambda i, k: (i, 0, 0)),
        scratch_shapes=[pltpu.VMEM((block_n, c, 1), jnp.float32)],
        compiler_params=pltpu.CompilerParams(
            dimension_semantics=("parallel", "arbitrary")),
    )(x)

    # Degenerate (N,C)x(C,CR) matmuls: keep them in XLA, not the hot kernel.
    y = jnp.maximum(pooled[:, :, 0] @ w1_eff + b1, 0.0)
    s = jax.nn.sigmoid(y @ w2_t + b2)                         # (N, C)
    s3 = s.astype(jnp.float32)[:, :, None]                    # (N, C, 1)

    out = pl.pallas_call(
        _scale_kernel,
        out_shape=jax.ShapeDtypeStruct((n, c, hw), x.dtype),
        grid=grid,
        in_specs=[
            pl.BlockSpec((block_n, c, 1), lambda i, k: (i, 0, 0)),
            pl.BlockSpec((block_n, c, block_hw), lambda i, k: (i, 0, k)),
        ],
        out_specs=pl.BlockSpec((block_n, c, block_hw), lambda i, k: (i, 0, k)),
        compiler_params=pltpu.CompilerParams(
            dimension_semantics=("parallel", "parallel")),
    )(s3, x)
    return out.reshape(n, c, h, w)


# --------------------------------------------------------------------------
# Pure-JAX reference of the PyTorch forward (same param layout).
# --------------------------------------------------------------------------
def reference_forward(x_nchw, params):
    w1_t, b1, masks, thr, w2_t, b2 = params
    x = x_nchw.astype(jnp.float32)
    pooled = jnp.mean(x, axis=(2, 3))                         # (N, C)
    acc = jnp.zeros((1, w1_t.shape[1]), jnp.float32)
    for i in range(masks.shape[0] - 1, -1, -1):
        m = masks[i:i + 1]
        norm = jnp.linalg.norm(w1_t * m)
        ind = (norm > thr[i]).astype(jnp.float32)
        acc = ind * (m + acc)
    y = pooled @ (w1_t * acc) + b1
    y = jax.nn.relu(y)
    y = y @ w2_t + b2
    s = jax.nn.sigmoid(y)
    return x * s[:, :, None, None]


if __name__ == "__main__":
    # Small shapes consistent with the module (C = 8 in/out channels, c_red = 4).
    N, C, H, W = 4, 8, 16, 16
    c_muls = sorted((0.0, 0.25, 0.5))
    max_c_mul = max(c_muls)
    c_red = int(C * max_c_mul)                                # 4
    c_out_list = [int((cm / max_c_mul) * c_red) for cm in c_muls]  # [0, 2, 4]

    key = jax.random.PRNGKey(0)
    kx, kw1, kw2, kb2 = jax.random.split(key, 4)
    x = jax.random.normal(kx, (N, C, H, W), jnp.float32)

    # fc1 (SuperKernelThresholdConv, k=1): kaiming_normal fan_out, bias zeros.
    w1 = jax.random.normal(kw1, (c_red, C), jnp.float32) * jnp.sqrt(2.0 / c_red)
    b1 = jnp.zeros((1, c_red), jnp.float32)

    # Disjoint per-output-channel masks built from c_out_list, as in __init__.
    ch = jnp.arange(c_red)
    mask_rows, prev = [], jnp.zeros((c_red,), jnp.float32)
    for cs in c_out_list:
        m = (ch < cs).astype(jnp.float32) - prev
        mask_rows.append(m)
        prev = prev + m
    masks_c = jnp.stack(mask_rows, axis=0)                    # (3, c_red)

    # Module inits thresholds to zeros (first mask has norm 0 -> mask all-zero);
    # use deterministic nonzero values so every indicator branch is exercised.
    thr = jnp.array([-1.0, 0.0, 100.0], jnp.float32)

    # excite conv: nn.Conv2d(c_red, C, 1, bias=True)
    w2 = jax.random.normal(kw2, (C, c_red), jnp.float32) * 0.3
    b2 = jax.random.normal(kb2, (1, C), jnp.float32) * 0.1

    params = (w1.T, b1, masks_c, thr, w2.T, b2)
    ref = reference_forward(x, params)

    # 1) fused path, real grid over N (2 tiles).
    out_fused = super_se_forward(x, params, mode="fused", block_n=2)
    jax.block_until_ready(out_fused)
    assert out_fused.shape == x.shape and out_fused.dtype == x.dtype
    assert jnp.allclose(out_fused, ref, atol=1e-4, rtol=1e-4), "fused mismatch"

    # 2) split path: HW-tiled pooled reduction (accumulator) + tiled scale.
    out_split = super_se_forward(x, params, mode="split", block_n=2, block_hw=128)
    jax.block_until_ready(out_split)
    assert jnp.allclose(out_split, ref, atol=1e-4, rtol=1e-4), "split mismatch"

    # 3) auto mode (picks fused with the largest fitting N block).
    out_auto = super_se_forward(x, params)
    jax.block_until_ready(out_auto)
    assert jnp.allclose(out_auto, ref, atol=1e-4, rtol=1e-4), "auto mismatch"

    # 4) bf16 HBM I/O (halved bandwidth); arithmetic stays f32 in-kernel.
    out_bf16 = super_se_forward(x.astype(jnp.bfloat16), params, mode="fused",
                                block_n=2)
    jax.block_until_ready(out_bf16)
    assert out_bf16.dtype == jnp.bfloat16
    assert jnp.allclose(out_bf16.astype(jnp.float32), ref, atol=5e-2, rtol=5e-2), \
        "bf16 mismatch"

    print("KERNEL_OK")
</pallas_src>

<mosaic_0001>
module attributes {stable_mosaic.version = 11 : i64} {
  func.func @_trainable_mask_kernel(%arg0: memref<8x4xf32, #tpu.memory_space<vmem>>, %arg1: memref<3x4xf32, #tpu.memory_space<vmem>>, %arg2: memref<3xf32, #tpu.memory_space<smem>>, %arg3: memref<1x4xf32, #tpu.memory_space<vmem>>) attributes {dimension_semantics = [], scalar_prefetch = 0 : i64, scratch_operands = 0 : i64, tpu.core_type = #tpu.core_type<tc>} {
    %c0 = arith.constant 0 : index
    %c0_0 = arith.constant 0 : index
    %0 = vector.load %arg0[%c0, %c0_0] : memref<8x4xf32, #tpu.memory_space<vmem>>, vector<8x4xf32>
    %cst = arith.constant 0.000000e+00 : f32
    %1 = vector.broadcast %cst : f32 to vector<1x4xf32>
    %c2 = arith.constant 2 : index
    %c0_1 = arith.constant 0 : index
    %2 = vector.load %arg1[%c2, %c0_1] : memref<3x4xf32, #tpu.memory_space<vmem>>, vector<1x4xf32>
    %3 = vector.broadcast %2 : vector<1x4xf32> to vector<8x4xf32>
    %4 = arith.mulf %0, %3 : vector<8x4xf32>
    %5 = arith.mulf %4, %4 : vector<8x4xf32>
    %cst_2 = arith.constant dense<0.000000e+00> : vector<8xf32>
    %6 = vector.multi_reduction <add>, %5, %cst_2 [1] : vector<8x4xf32> to vector<8xf32>
    %7 = vector.shape_cast %6 : vector<8xf32> to vector<8x1xf32>
    %cst_3 = arith.constant dense<0.000000e+00> : vector<1xf32>
    %8 = vector.multi_reduction <add>, %7, %cst_3 [0] : vector<8x1xf32> to vector<1xf32>
    %9 = vector.shape_cast %8 : vector<1xf32> to vector<1x1xf32>
    %10 = math.sqrt %9 : vector<1x1xf32>
    %c2_4 = arith.constant 2 : index
    %11 = memref.load %arg2[%c2_4] : memref<3xf32, #tpu.memory_space<smem>>
    %12 = vector.broadcast %11 : f32 to vector<1x1xf32>
    %13 = arith.cmpf ogt, %10, %12 : vector<1x1xf32>
    %14 = arith.extui %13 : vector<1x1xi1> to vector<1x1xi32>
    %15 = arith.sitofp %14 : vector<1x1xi32> to vector<1x1xf32>
    %16 = arith.addf %2, %1 : vector<1x4xf32>
    %17 = vector.broadcast %15 : vector<1x1xf32> to vector<1x4xf32>
    %18 = arith.mulf %17, %16 : vector<1x4xf32>
    %c1 = arith.constant 1 : index
    %c0_5 = arith.constant 0 : index
    %19 = vector.load %arg1[%c1, %c0_5] : memref<3x4xf32, #tpu.memory_space<vmem>>, vector<1x4xf32>
    %20 = vector.broadcast %19 : vector<1x4xf32> to vector<8x4xf32>
    %21 = arith.mulf %0, %20 : vector<8x4xf32>
    %22 = arith.mulf %21, %21 : vector<8x4xf32>
    %cst_6 = arith.constant dense<0.000000e+00> : vector<8xf32>
    %23 = vector.multi_reduction <add>, %22, %cst_6 [1] : vector<8x4xf32> to vector<8xf32>
    %24 = vector.shape_cast %23 : vector<8xf32> to vector<8x1xf32>
    %cst_7 = arith.constant dense<0.000000e+00> : vector<1xf32>
    %25 = vector.multi_reduction <add>, %24, %cst_7 [0] : vector<8x1xf32> to vector<1xf32>
    %26 = vector.shape_cast %25 : vector<1xf32> to vector<1x1xf32>
    %27 = math.sqrt %26 : vector<1x1xf32>
    %c1_8 = arith.constant 1 : index
    %28 = memref.load %arg2[%c1_8] : memref<3xf32, #tpu.memory_space<smem>>
    %29 = vector.broadcast %28 : f32 to vector<1x1xf32>
    %30 = arith.cmpf ogt, %27, %29 : vector<1x1xf32>
    %31 = arith.extui %30 : vector<1x1xi1> to vector<1x1xi32>
    %32 = arith.sitofp %31 : vector<1x1xi32> to vector<1x1xf32>
    %33 = arith.addf %19, %18 : vector<1x4xf32>
    %34 = vector.broadcast %32 : vector<1x1xf32> to vector<1x4xf32>
    %35 = arith.mulf %34, %33 : vector<1x4xf32>
    %c0_9 = arith.constant 0 : index
    %c0_10 = arith.constant 0 : index
    %36 = vector.load %arg1[%c0_9, %c0_10] : memref<3x4xf32, #tpu.memory_space<vmem>>, vector<1x4xf32>
    %37 = vector.broadcast %36 : vector<1x4xf32> to vector<8x4xf32>
    %38 = arith.mulf %0, %37 : vector<8x4xf32>
    %39 = arith.mulf %38, %38 : vector<8x4xf32>
    %cst_11 = arith.constant dense<0.000000e+00> : vector<8xf32>
    %40 = vector.multi_reduction <add>, %39, %cst_11 [1] : vector<8x4xf32> to vector<8xf32>
    %41 = vector.shape_cast %40 : vector<8xf32> to vector<8x1xf32>
    %cst_12 = arith.constant dense<0.000000e+00> : vector<1xf32>
    %42 = vector.multi_reduction <add>, %41, %cst_12 [0] : vector<8x1xf32> to vector<1xf32>
    %43 = vector.shape_cast %42 : vector<1xf32> to vector<1x1xf32>
    %44 = math.sqrt %43 : vector<1x1xf32>
    %c0_13 = arith.constant 0 : index
    %45 = memref.load %arg2[%c0_13] : memref<3xf32, #tpu.memory_space<smem>>
    %46 = vector.broadcast %45 : f32 to vector<1x1xf32>
    %47 = arith.cmpf ogt, %44, %46 : vector<1x1xf32>
    %48 = arith.extui %47 : vector<1x1xi1> to vector<1x1xi32>
    %49 = arith.sitofp %48 : vector<1x1xi32> to vector<1x1xf32>
    %50 = arith.addf %36, %35 : vector<1x4xf32>
    %51 = vector.broadcast %49 : vector<1x1xf32> to vector<1x4xf32>
    %52 = arith.mulf %51, %50 : vector<1x4xf32>
    %c0_14 = arith.constant 0 : index
    %c0_15 = arith.constant 0 : index
    %53 = vector.load %arg3[%c0_14, %c0_15] : memref<1x4xf32, #tpu.memory_space<vmem>>, vector<1x4xf32>
    tpu.vector_store %arg3[%c0_14, %c0_15], %52 {strides = array<i32>} : memref<1x4xf32, #tpu.memory_space<vmem>>, vector<1x4xf32>,
    return
  }
}

</mosaic_0001>

<bundles_post_ra>
// kernel: tpu_custom_call.1
= control target key start
LH: loop header
LB: loop body
LE: loop exit
PB: predicated region body
PF: predicated region fallthrough
CT: control target
= control target key end

     0   :  { %8 = vsyncpa [#allocation4], 0  ;;  %s254_s0 = inlined_call_operand.vmem [shape: f32[8,4], index: 0, kind: input, shape index: {}]   ;;  %s255_s1 = inlined_call_operand.vmem [shape: f32[3,4], index: 1, kind: input, shape index: {}]   ;;  %s256_s2 = inlined_call_operand.vmem [shape: f32[3], index: 2, kind: input, shape index: {}]   ;;  %s257_s3 = inlined_call_operand.hbm [shape: f32[1,4], index: 3, kind: output, shape index: {}]  }
   0x1   :  { %9 = vsyncpa [#allocation3], 0  ;;  %s20_s14 = sshll.u32 %s256_s2, 4  ;;  %s21_s14 = int_to_ptr.vmem [resolvable:$true] %s20_s14 }
   0x2   :  { %s151_s15 = scalar_lea.vmem %s21_s14, 16  ;;  %p156_p1 = scmp.lt.s32.totalorder %s21_s14, %s21_s14 }
   0x3   :  { %p152_p0 = scmp.ne.s32.totalorder %s21_s14, %s151_s15  ;;  %p157_p2 = scmp.lt.s32.totalorder %s151_s15, %s151_s15 }
   0x5   :  { %p158_p3 = por %p157_p2, %p156_p1 }
   0x7   :  { %p159_p4 = pnand %p158_p3, %p152_p0 }
   0x9   :  { %162 = shalt.err (!%p159_p4)
}
   0xa   :  { %s189_s16 = smov [#allocation2]  }
   0xb   :  { %23 = dma.vmem_to_smem %s21_s14, 16, %s189_s16, [#allocation4]  }
   0xc   :  { %185 = dma.done.wait [#allocation4], 16  }
   0xd   :  { %186 = vsyncadd [#allocation4], 4294967280 }
   0xe   :  { %27 = sfence }
   0xf   :  { %v30_v0 = vlaneseq  ;;  %v218_v2 = vld [vmem:[%s255_s1] sm:$0x1]  ;;  %v223_v3 = vld [vmem:[%s255_s1 + $0x2] sm:$0x1]  ;;  %v228_v4 = vld [vmem:[%s255_s1 + $0x1] sm:$0x1] }
  0x10   :  { %v28_v6 = vld [vmem:[%s254_s0] sm:$0xff]  ;;  %vm36_vm0 = vcmask 31744   ;;  %s137_s0 = sld [smem:[#allocation2 + $0x2]]  ;;  %s139_s1 = sld [smem:[#allocation2 + $0x1]]  ;;  %v190_v53 = vmov 0.0   ;;  %vm120_vm10 = vcmask 24576  }
  0x11   :  { %v31_v1 = vshrl.u32 %v30_v0, 7  ;;  %s236_s24 = sld [smem:[#allocation2]]  ;;  %s191_s25 = smov [#allocation5]  }
  0x12   :  { %s128_s26 = sshll.u32 %s191_s25, 4  ;;  %s129_s26 = int_to_ptr.vmem [resolvable:$true] %s128_s26 }
  0x13   :  { %v32_v5 = vsub.s32 0, %v31_v1  ;;  %s163_s27 = scalar_lea.vmem %s129_s26, 16  ;;  %s167_s28 = scalar_lea.vmem %s129_s26, 32 }
  0x14   :  { %p164_p5 = scmp.ne.s32.totalorder %s129_s26, %s163_s27  ;;  %p168_p6 = scmp.lt.s32.totalorder %s129_s26, %s129_s26 }
  0x15   :  { %v94_v7 = vrot.slane %v218_v2, %v32_v5  ;;  %v33_v8 = vrot.slane %v223_v3, %v32_v5  ;;  %v64_v9 = vrot.slane %v228_v4, %v32_v5  ;;  %p169_p7 = scmp.lt.s32.totalorder %s167_s28, %s163_s27 }
  0x16   :  { %v54_v45 = vstv %s137_s0  ;;  %v84_v50 = vstv %s139_s1 }
  0x17   :  { %v95_v10 = vmul.f32 %v94_v7, %v28_v6  ;;  %v34_v11 = vmul.f32 %v33_v8, %v28_v6  ;;  %v65_v12 = vmul.f32 %v64_v9, %v28_v6  ;;  %v114_v60 = vstv %s236_s24  ;;  %p170_p8 = por %p169_p7, %p168_p6 }
  0x19   :  { %v96_v13 = vmul.f32 %v95_v10, %v95_v10  ;;  %v35_v14 = vmul.f32 %v34_v11, %v34_v11  ;;  %v66_v15 = vmul.f32 %v65_v12, %v65_v12  ;;  %p171_p9 = pnand %p170_p8, %p164_p5 }
  0x1b   :  { %v97_v16 = vsel %vm36_vm0, %v96_v13, 0.0  ;;  %v37_v17 = vsel %vm36_vm0, %v35_v14, 0.0  ;;  %v67_v18 = vsel %vm36_vm0, %v66_v15, 0.0 }
  0x1c   :  { %98 = vadd.xlane.f32.xlu1 %v97_v16  ;;  %38 = vadd.xlane.f32.xlu0 %v37_v17 }
  0x20   :  { %68 = vadd.xlane.f32.xlu0 %v67_v18 }
  0xa9   :  { %v99_v19 = vpop.xlane.xlu1 %98  ;;  %v39_v20 = vpop.xlane.xlu0 %38 }
  0xaa   :  { %v100_v21 = vrot.slane %v99_v19, 4  ;;  %v40_v22 = vrot.slane %v39_v20, 4 }
  0xac   :  { %v101_v23 = vadd.f32 %v100_v21, %v99_v19  ;;  %v41_v24 = vadd.f32 %v40_v22, %v39_v20 }
  0xad   :  { %v69_v25 = vpop.xlane.xlu0 %68 }
  0xae   :  { %v102_v26 = vrot.slane %v101_v23, 2  ;;  %v42_v27 = vrot.slane %v41_v24, 2  ;;  %v70_v28 = vrot.slane %v69_v25, 4 }
  0xb0   :  { %v103_v29 = vadd.f32 %v102_v26, %v101_v23  ;;  %v43_v30 = vadd.f32 %v42_v27, %v41_v24  ;;  %v71_v31 = vadd.f32 %v70_v28, %v69_v25 }
  0xb2   :  { %v104_v32 = vrot.slane %v103_v29, 1  ;;  %v44_v33 = vrot.slane %v43_v30, 1  ;;  %v72_v34 = vrot.slane %v71_v31, 2 }
  0xb4   :  { %v105_v35 = vadd.f32 %v104_v32, %v103_v29  ;;  %v45_v36 = vadd.f32 %v44_v33, %v43_v30  ;;  %v73_v37 = vadd.f32 %v72_v34, %v71_v31 }
  0xb6   :  { %145 = vrsqrt.f32 %v105_v35  ;;  %v74_v38 = vrot.slane %v73_v37, 1  ;;  %vm48_vm1 = vcmp.eq.f32.partialorder %v45_v36, inf  ;;  %v51_v44 = vand.u32 2147483648, %v45_v36 }
  0xb7   :  { %147 = vrsqrt.f32 %v45_v36  ;;  %vm50_vm2 = vcmp.eq.f32.partialorder %v45_v36, 0.0  ;;  %vm108_vm3 = vcmp.eq.f32.partialorder %v105_v35, inf  ;;  %v111_v56 = vand.u32 2147483648, %v105_v35 }
  0xb8   :  { %v75_v39 = vadd.f32 %v74_v38, %v73_v37  ;;  %vm110_vm7 = vcmp.eq.f32.partialorder %v105_v35, 0.0 }
  0xba   :  { %149 = vrsqrt.f32 %v75_v39  ;;  %vm78_vm5 = vcmp.eq.f32.partialorder %v75_v39, inf  ;;  %v81_v51 = vand.u32 2147483648, %v75_v39  ;;  %vm80_vm6 = vcmp.eq.f32.partialorder %v75_v39, 0.0 }
  0xc0   :  { %v146_v40 = vpop.eup %145 }
  0xc1   :  { %v148_v41 = vpop.eup %147  ;;  %v107_v43 = vmul.f32 %v146_v40, %v105_v35 }
  0xc2   :  { %v47_v42 = vmul.f32 %v148_v41, %v45_v36 }
  0xc3   :  { %v109_v52 = vsel %vm108_vm3, %v105_v35, %v107_v43 }
  0xc4   :  { %v150_v46 = vpop.eup %149  ;;  %v49_v47 = vsel %vm48_vm1, %v45_v36, %v47_v42  ;;  %v112_v59 = vsel %vm110_vm7, %v111_v56, %v109_v52 }
  0xc5   :  { %v52_v48 = vsel %vm50_vm2, %v51_v44, %v49_v47  ;;  %v77_v49 = vmul.f32 %v150_v46, %v75_v39  ;;  %vm115_vm9 = vcmp.gt.f32.partialorder %v112_v59, %v114_v60 }
  0xc6   :  { %vm55_vm4 = vcmp.gt.f32.partialorder %v52_v48, %v54_v45  ;;  %v141_v1 = vsel %vm115_vm9, 1.0, %v190_v53 }
  0xc7   :  { %v138_v54 = vsel %vm55_vm4, 1.0, %v190_v53  ;;  %v79_v55 = vsel %vm78_vm5, %v75_v39, %v77_v49 }
  0xc8   :  { %v59_v57 = vmul.f32 %v138_v54, %v223_v3  ;;  %v82_v58 = vsel %vm80_vm6, %v81_v51, %v79_v55 }
  0xc9   :  { %vm85_vm8 = vcmp.gt.f32.partialorder %v82_v58, %v84_v50 }
  0xca   :  { %v140_v61 = vsel %vm85_vm8, 1.0, %v190_v53  ;;  %v88_v62 = vadd.f32 %v228_v4, %v59_v57 }
  0xcc   :  { %v89_v63 = vmul.f32 %v140_v61, %v88_v62 }
  0xce   :  { %v118_v0 = vadd.f32 %v218_v2, %v89_v63 }
  0xd0   :  { %v119_v5 = vmul.f32 %v141_v1, %v118_v0 }
  0xd2   :  { %121 = vst.msk [vmem:[#allocation5] sm:$0x1] %vm120_vm10, %v119_v5 }
  0xd3   :  { %174 = shalt.err (!%p171_p9)
}
  0xd4   :  { %s175_s4 = scalar_lea.hbm %s257_s3, 16 }
  0xd5   :  { %p176_p10 = scmp.ne.s32.totalorder %s257_s3, %s175_s4  ;;  %p179_p11 = scmp.lt.u32.totalorder %s175_s4, %s257_s3 }
  0xd7   :  { %p181_p12 = pnand %p179_p11, %p176_p10 }
  0xd9   :  { %184 = shalt.err (!%p181_p12)
}
  0xda   :  { %131 = dma.vmem_to_hbm [thread:$0]  %s129_s26, 16, %s257_s3, [#allocation3]  }
  0xdb   :  { %187 = dma.done.wait [#allocation3], 16  }
  0xdc   :  { %188 = vsyncadd [#allocation3], 4294967280 }
  0xdd   :  { %135 = vsyncpa [#allocation3], 1 }
  0xde   :  { %136 = vsyncpa [#allocation4], 1 }

</bundles_post_ra>
